<compile_context>
chip_gen: v6e
topology: v6e:2x2x1
jax: 0.10.0
libtpu: 0.0.40
codegen_flags: <defaults>
</compile_context>

<pallas_src>
from functools import partial

import numpy as np
import jax
import jax.numpy as jnp
from jax.experimental import pallas as pl
from jax.experimental.pallas import tpu as pltpu


# ---------------------------------------------------------------------------
# Kernel 1: per-phase GEMM (lane-dense) + bias + fused BN partial statistics
# ---------------------------------------------------------------------------
def _conv_stats_kernel(p_ref, w_ref, b_ref, o_ref, sum_ref, ssq_ref):
    ph = pl.program_id(0)
    i = pl.program_id(1)

    @pl.when(jnp.logical_and(ph == 0, i == 0))
    def _():
        sum_ref[...] = jnp.zeros_like(sum_ref)
        ssq_ref[...] = jnp.zeros_like(ssq_ref)

    # (Cout, Kd) @ (Kd, tm) -> (Cout, tm): output minor dim is the 128-multiple
    # tile -> lane-dense stores; bias broadcast is per-tile and tiny.
    y = jnp.dot(w_ref[0], p_ref[0], preferred_element_type=jnp.float32) + b_ref[...]
    o_ref[0] = y
    # Grid-resident accumulators (same block for every grid step).
    sum_ref[...] += jnp.sum(y, axis=1, keepdims=True)
    ssq_ref[...] += jnp.sum(y * y, axis=1, keepdims=True)


# ---------------------------------------------------------------------------
# Kernel 2: tiled normalize (precomputed scale/shift) + ReLU
# ---------------------------------------------------------------------------
def _bn_relu_kernel(x_ref, sc_ref, sh_ref, o_ref):
    o_ref[...] = jnp.maximum(x_ref[...] * sc_ref[...] + sh_ref[...], 0.0)


def _pick_tile(m, bytes_per_col, budget=8 * 1024 * 1024):
    """Largest multiple of 128 dividing m with per-step footprint under budget.
    Falls back to the full axis (allowed: block dim equals the array dim)."""
    cap = max(128, budget // max(bytes_per_col, 1))
    cap = min(cap, 4096, m)
    t = (cap // 128) * 128
    while t >= 128:
        if m % t == 0:
            return t
        t -= 128
    return m


# ---------------------------------------------------------------------------
# Wrapper: upsample.forward
# ---------------------------------------------------------------------------
def upsample_forward(x, w_t, bias, gamma, beta, *, stride, padding, eps=1e-5):
    """x: (N, Cin, H, W) fp32.  w_t: (Cin, Cout, K, K) ConvTranspose2d weight.
    Returns (N, Cout, OH, OW) fp32 (BatchNorm in training mode, then ReLU)."""
    N, Cin, H, W = map(int, x.shape)
    _, Cout, K, _ = map(int, w_t.shape)
    s, p = int(stride), int(padding)
    OH = (H - 1) * s - 2 * p + K
    OW = (W - 1) * s - 2 * p + K

    # TODO(synk): shapes with K % s != 0 or OH/OW % s != 0 need the slower
    # zero-dilated fallback; the sub-pixel fast path covers this module's config.
    assert K % s == 0 and OH % s == 0 and OW % s == 0

    Ks = K // s                      # sub-kernel extent per phase
    OHs, OWs = OH // s, OW // s      # per-phase output spatial extent
    P = s * s                        # number of output phases
    Kd = Cin * Ks * Ks               # dense contraction size (no zeros)
    Mp = N * OHs * OWs               # rows per phase

    # ---- glue (cheap JAX): per-phase dense im2col over the ORIGINAL x,
    #      built transposed (Kd, Mp) so the GEMM output is lane-dense. ----
    patch_list, w_list, off = [], [], []
    for rh in range(s):
        for rw in range(s):
            oh0 = (rh - p) % s
            ow0 = (rw - p) % s
            ch = (oh0 + p - rh) // s
            cw = (ow0 + p - rw) // s
            padl_h = max(0, (Ks - 1) - ch)
            padh_h = max(0, (OHs - 1 + ch) - (H - 1))
            padl_w = max(0, (Ks - 1) - cw)
            padh_w = max(0, (OWs - 1 + cw) - (W - 1))
            xp = jnp.pad(x, ((0, 0), (0, 0), (padl_h, padh_h), (padl_w, padh_w)))
            taps = []
            for mh in range(Ks):
                for mw in range(Ks):
                    sh = ch - mh + padl_h
                    sw = cw - mw + padl_w
                    taps.append(xp[:, :, sh:sh + OHs, sw:sw + OWs])  # (N,Cin,OHs,OWs)
            tp = jnp.stack(taps, axis=2)                  # (N, Cin, Ks*Ks, OHs, OWs)
            tp = tp.transpose(1, 2, 0, 3, 4).reshape(Kd, Mp)
            patch_list.append(tp)
            w_sub = w_t[:, :, rh::s, rw::s]               # (Cin, Cout, Ks, Ks)
            w_list.append(w_sub.transpose(1, 0, 2, 3).reshape(Cout, Kd))
            off.append((oh0, ow0))

    patches = jnp.stack(patch_list, axis=0)               # (P, Kd, Mp)
    wms = jnp.stack(w_list, axis=0)                       # (P, Cout, Kd)
    b2 = bias.reshape(Cout, 1).astype(jnp.float32)

    # ---- Pallas kernel 1: conv GEMM + bias + fused BN sum/sumsq ----
    tm = _pick_tile(Mp, 8 * (Kd + Cout))     # 2x double-buffered patch + out cols
    conv, sums, ssq = pl.pallas_call(
        _conv_stats_kernel,
        out_shape=(
            jax.ShapeDtypeStruct((P, Cout, Mp), jnp.float32),
            jax.ShapeDtypeStruct((Cout, 1), jnp.float32),
            jax.ShapeDtypeStruct((Cout, 1), jnp.float32),
        ),
        grid=(P, Mp // tm),
        in_specs=[
            pl.BlockSpec((1, Kd, tm), lambda ph, i: (ph, 0, i)),
            pl.BlockSpec((1, Cout, Kd), lambda ph, i: (ph, 0, 0)),
            pl.BlockSpec((Cout, 1), lambda ph, i: (0, 0)),
        ],
        out_specs=(
            pl.BlockSpec((1, Cout, tm), lambda ph, i: (ph, 0, i)),
            pl.BlockSpec((Cout, 1), lambda ph, i: (0, 0)),
            pl.BlockSpec((Cout, 1), lambda ph, i: (0, 0)),
        ),
        # accumulators span the whole grid -> both axes must be 'arbitrary'
        compiler_params=pltpu.CompilerParams(
            dimension_semantics=("arbitrary", "arbitrary")),
    )(patches, wms, b2)

    # ---- tiny per-channel stats -> affine scale/shift (plain JAX) ----
    Mtot = float(P * Mp)                                   # = N*OH*OW
    mean = sums / Mtot
    # TODO(synk): for very large M switch to a two-pass centered variance to
    # avoid E[x^2]-E[x]^2 cancellation; fine at these magnitudes/sizes.
    var = jnp.maximum(ssq / Mtot - mean * mean, 0.0)       # biased (training BN)
    inv = jax.lax.rsqrt(var + eps)
    scale = gamma.reshape(Cout, 1).astype(jnp.float32) * inv
    shift = beta.reshape(Cout, 1).astype(jnp.float32) - mean * scale

    # ---- Pallas kernel 2: tiled normalize + ReLU (lane-dense, parallel) ----
    tm2 = _pick_tile(Mp, 16 * Cout)
    y = pl.pallas_call(
        _bn_relu_kernel,
        out_shape=jax.ShapeDtypeStruct((P, Cout, Mp), jnp.float32),
        grid=(P, Mp // tm2),
        in_specs=[
            pl.BlockSpec((1, Cout, tm2), lambda ph, i: (ph, 0, i)),
            pl.BlockSpec((Cout, 1), lambda ph, i: (0, 0)),
            pl.BlockSpec((Cout, 1), lambda ph, i: (0, 0)),
        ],
        out_specs=pl.BlockSpec((1, Cout, tm2), lambda ph, i: (ph, 0, i)),
        compiler_params=pltpu.CompilerParams(
            dimension_semantics=("parallel", "parallel")),
    )(conv, scale, shift)

    # ---- reassemble phases into NCHW (cheap strided sets, s*s of them) ----
    y = y.reshape(s, s, Cout, N, OHs, OWs)
    out = jnp.zeros((N, Cout, OH, OW), jnp.float32)
    idx = 0
    for rh in range(s):
        for rw in range(s):
            oh0, ow0 = off[idx]
            idx += 1
            out = out.at[:, :, oh0::s, ow0::s].set(
                jnp.transpose(y[rh, rw], (1, 0, 2, 3)))
    return out


# ---------------------------------------------------------------------------
# Independent numpy reference (direct scatter form of ConvTranspose2d)
# ---------------------------------------------------------------------------
def reference_forward(x, w_t, bias, gamma, beta, stride, padding, eps=1e-5):
    N, Cin, H, W = x.shape
    _, Cout, K, _ = w_t.shape
    s, p = stride, padding
    OH = (H - 1) * s - 2 * p + K
    OW = (W - 1) * s - 2 * p + K
    full = np.zeros((N, Cout, (H - 1) * s + K, (W - 1) * s + K), np.float32)
    for kh in range(K):
        for kw in range(K):
            contrib = np.einsum('nchw,cd->ndhw', x, w_t[:, :, kh, kw])
            full[:, :, kh:kh + (H - 1) * s + 1:s,
                       kw:kw + (W - 1) * s + 1:s] += contrib
    out = full[:, :, p:p + OH, p:p + OW] + bias.reshape(1, Cout, 1, 1)
    mean = out.mean(axis=(0, 2, 3), keepdims=True)
    var = out.var(axis=(0, 2, 3), keepdims=True)   # biased var (training BN)
    y = (out - mean) / np.sqrt(var + eps) * gamma.reshape(1, Cout, 1, 1) \
        + beta.reshape(1, Cout, 1, 1)
    return np.maximum(y, 0.0)


if __name__ == "__main__":
    # upsample(in_channel=4, kernel=4, stride=2, padding=1) on x:(2,4,16,16)
    N, Cin, H, W = 2, 4, 16, 16
    K, stride, padding = 4, 2, 1
    Cout = Cin // 2

    key = jax.random.PRNGKey(0)
    k1, k2, k3 = jax.random.split(key, 3)
    x = jax.random.normal(k1, (N, Cin, H, W), jnp.float32)
    fan = float(Cin * K * K)
    w_t = jax.random.normal(k2, (Cin, Cout, K, K), jnp.float32) / np.sqrt(fan)
    bias = 0.1 * jax.random.normal(k3, (Cout,), jnp.float32)
    gamma = jnp.ones((Cout,), jnp.float32)   # BatchNorm2d default init
    beta = jnp.zeros((Cout,), jnp.float32)

    fwd = jax.jit(partial(upsample_forward, stride=stride, padding=padding))
    out = jax.block_until_ready(fwd(x, w_t, bias, gamma, beta))

    OH = (H - 1) * stride - 2 * padding + K
    OW = (W - 1) * stride - 2 * padding + K
    assert out.shape == (N, Cout, OH, OW)

    ref = reference_forward(np.array(x), np.array(w_t), np.array(bias),
                            np.array(gamma), np.array(beta), stride, padding)
    np.testing.assert_allclose(np.array(out), ref, rtol=1e-4, atol=1e-4)
    print("KERNEL_OK")
</pallas_src>

<mosaic_0001>
module attributes {stable_mosaic.version = 11 : i64} {
  func.func @_conv_stats_kernel(%arg0: i32, %arg1: i32, %arg2: memref<1x16x512xf32, #tpu.memory_space<vmem>>, %arg3: memref<1x2x16xf32, #tpu.memory_space<vmem>>, %arg4: memref<2x1xf32, #tpu.memory_space<vmem>>, %arg5: memref<1x2x512xf32, #tpu.memory_space<vmem>>, %arg6: memref<2x1xf32, #tpu.memory_space<vmem>>, %arg7: memref<2x1xf32, #tpu.memory_space<vmem>>) attributes {dimension_semantics = [#tpu.dimension_semantics<arbitrary>, #tpu.dimension_semantics<arbitrary>], iteration_bounds = array<i64: 4, 1>, scalar_prefetch = 0 : i64, scratch_operands = 0 : i64, tpu.core_type = #tpu.core_type<tc>, window_params = [{transform_indices = @transform_0, window_bounds = array<i64: 1, 16, 512>}, {transform_indices = @transform_1, window_bounds = array<i64: 1, 2, 16>}, {pipeline_mode = #tpu.pipeline_mode<synchronous>, transform_indices = @transform_2, window_bounds = array<i64: 2, 1>}, {transform_indices = @transform_3, window_bounds = array<i64: 1, 2, 512>}, {pipeline_mode = #tpu.pipeline_mode<synchronous>, transform_indices = @transform_4, window_bounds = array<i64: 2, 1>}, {pipeline_mode = #tpu.pipeline_mode<synchronous>, transform_indices = @transform_5, window_bounds = array<i64: 2, 1>}]} {
    %c0_i32 = arith.constant 0 : i32
    %0 = arith.cmpi eq, %arg0, %c0_i32 : i32
    %c0_i32_0 = arith.constant 0 : i32
    %1 = arith.cmpi eq, %arg1, %c0_i32_0 : i32
    %2 = arith.andi %0, %1 : i1
    %3 = arith.extui %2 : i1 to i32
    %c0_i32_1 = arith.constant 0 : i32
    %4 = arith.cmpi ne, %3, %c0_i32_1 : i32
    scf.if %4 {
      %cst_22 = arith.constant 0.000000e+00 : f32
      %27 = vector.broadcast %cst_22 : f32 to vector<2x1xf32>
      %c0_23 = arith.constant 0 : index
      %c0_24 = arith.constant 0 : index
      %28 = vector.load %arg6[%c0_23, %c0_24] : memref<2x1xf32, #tpu.memory_space<vmem>>, vector<2x1xf32>
      tpu.vector_store %arg6[%c0_23, %c0_24], %27 {strides = array<i32>} : memref<2x1xf32, #tpu.memory_space<vmem>>, vector<2x1xf32>,
      %cst_25 = arith.constant 0.000000e+00 : f32
      %29 = vector.broadcast %cst_25 : f32 to vector<2x1xf32>
      %c0_26 = arith.constant 0 : index
      %c0_27 = arith.constant 0 : index
      %30 = vector.load %arg7[%c0_26, %c0_27] : memref<2x1xf32, #tpu.memory_space<vmem>>, vector<2x1xf32>
      tpu.vector_store %arg7[%c0_26, %c0_27], %29 {strides = array<i32>} : memref<2x1xf32, #tpu.memory_space<vmem>>, vector<2x1xf32>,
    } else {
    }
    %c0 = arith.constant 0 : index
    %c0_2 = arith.constant 0 : index
    %c0_3 = arith.constant 0 : index
    %5 = vector.load %arg3[%c0, %c0_2, %c0_3] : memref<1x2x16xf32, #tpu.memory_space<vmem>>, vector<1x2x16xf32>
    %6 = vector.shape_cast %5 : vector<1x2x16xf32> to vector<2x16xf32>
    %c0_4 = arith.constant 0 : index
    %c0_5 = arith.constant 0 : index
    %c0_6 = arith.constant 0 : index
    %7 = vector.load %arg2[%c0_4, %c0_5, %c0_6] : memref<1x16x512xf32, #tpu.memory_space<vmem>>, vector<1x16x512xf32>
    %8 = vector.shape_cast %7 : vector<1x16x512xf32> to vector<16x512xf32>
    %cst = arith.constant dense<0.000000e+00> : vector<2x512xf32>
    %9 = tpu.matmul %6, %8, %cst {dimension_numbers = #tpu.dot_dimension_numbers<[1], [0], [0], [1], [0, 0, 1, 1], [], []>} : vector<2x16xf32>, vector<16x512xf32>, vector<2x512xf32> -> vector<2x512xf32>
    %c0_7 = arith.constant 0 : index
    %c0_8 = arith.constant 0 : index
    %10 = vector.load %arg4[%c0_7, %c0_8] : memref<2x1xf32, #tpu.memory_space<vmem>>, vector<2x1xf32>
    %11 = vector.broadcast %10 : vector<2x1xf32> to vector<2x512xf32>
    %12 = arith.addf %9, %11 : vector<2x512xf32>
    %c0_9 = arith.constant 0 : index
    %c0_10 = arith.constant 0 : index
    %c0_11 = arith.constant 0 : index
    %13 = vector.load %arg5[%c0_9, %c0_10, %c0_11] : memref<1x2x512xf32, #tpu.memory_space<vmem>>, vector<1x2x512xf32>
    %14 = vector.shape_cast %13 : vector<1x2x512xf32> to vector<2x512xf32>
    %15 = vector.shape_cast %12 : vector<2x512xf32> to vector<1x2x512xf32>
    tpu.vector_store %arg5[%c0_9, %c0_10, %c0_11], %15 {strides = array<i32>} : memref<1x2x512xf32, #tpu.memory_space<vmem>>, vector<1x2x512xf32>,
    %c0_12 = arith.constant 0 : index
    %c0_13 = arith.constant 0 : index
    %16 = vector.load %arg6[%c0_12, %c0_13] : memref<2x1xf32, #tpu.memory_space<vmem>>, vector<2x1xf32>
    %cst_14 = arith.constant dense<0.000000e+00> : vector<2xf32>
    %17 = vector.multi_reduction <add>, %12, %cst_14 [1] : vector<2x512xf32> to vector<2xf32>
    %18 = vector.shape_cast %17 : vector<2xf32> to vector<2x1xf32>
    %19 = arith.addf %16, %18 : vector<2x1xf32>
    %c0_15 = arith.constant 0 : index
    %c0_16 = arith.constant 0 : index
    %20 = vector.load %arg6[%c0_15, %c0_16] : memref<2x1xf32, #tpu.memory_space<vmem>>, vector<2x1xf32>
    tpu.vector_store %arg6[%c0_15, %c0_16], %19 {strides = array<i32>} : memref<2x1xf32, #tpu.memory_space<vmem>>, vector<2x1xf32>,
    %c0_17 = arith.constant 0 : index
    %c0_18 = arith.constant 0 : index
    %21 = vector.load %arg7[%c0_17, %c0_18] : memref<2x1xf32, #tpu.memory_space<vmem>>, vector<2x1xf32>
    %22 = arith.mulf %12, %12 : vector<2x512xf32>
    %cst_19 = arith.constant dense<0.000000e+00> : vector<2xf32>
    %23 = vector.multi_reduction <add>, %22, %cst_19 [1] : vector<2x512xf32> to vector<2xf32>
    %24 = vector.shape_cast %23 : vector<2xf32> to vector<2x1xf32>
    %25 = arith.addf %21, %24 : vector<2x1xf32>
    %c0_20 = arith.constant 0 : index
    %c0_21 = arith.constant 0 : index
    %26 = vector.load %arg7[%c0_20, %c0_21] : memref<2x1xf32, #tpu.memory_space<vmem>>, vector<2x1xf32>
    tpu.vector_store %arg7[%c0_20, %c0_21], %25 {strides = array<i32>} : memref<2x1xf32, #tpu.memory_space<vmem>>, vector<2x1xf32>,
    return
  }
  func.func @transform_0(%arg0: i32, %arg1: i32) -> (i32, i32, i32) {
    %c0_i32 = arith.constant 0 : i32
    %c0_i32_0 = arith.constant 0 : i32
    return %arg0, %c0_i32, %arg1 : i32, i32, i32
  }
  func.func @transform_1(%arg0: i32, %arg1: i32) -> (i32, i32, i32) {
    %c0_i32 = arith.constant 0 : i32
    %c0_i32_0 = arith.constant 0 : i32
    %c0_i32_1 = arith.constant 0 : i32
    return %arg0, %c0_i32, %c0_i32_0 : i32, i32, i32
  }
  func.func @transform_2(%arg0: i32, %arg1: i32) -> (i32, i32) {
    %c0_i32 = arith.constant 0 : i32
    %c0_i32_0 = arith.constant 0 : i32
    %c0_i32_1 = arith.constant 0 : i32
    return %c0_i32, %c0_i32_0 : i32, i32
  }
  func.func @transform_3(%arg0: i32, %arg1: i32) -> (i32, i32, i32) {
    %c0_i32 = arith.constant 0 : i32
    %c0_i32_0 = arith.constant 0 : i32
    return %arg0, %c0_i32, %arg1 : i32, i32, i32
  }
  func.func @transform_4(%arg0: i32, %arg1: i32) -> (i32, i32) {
    %c0_i32 = arith.constant 0 : i32
    %c0_i32_0 = arith.constant 0 : i32
    %c0_i32_1 = arith.constant 0 : i32
    return %c0_i32, %c0_i32_0 : i32, i32
  }
  func.func @transform_5(%arg0: i32, %arg1: i32) -> (i32, i32) {
    %c0_i32 = arith.constant 0 : i32
    %c0_i32_0 = arith.constant 0 : i32
    %c0_i32_1 = arith.constant 0 : i32
    return %c0_i32, %c0_i32_0 : i32, i32
  }
}

module attributes {stable_mosaic.version = 11 : i64} {
  func.func @_bn_relu_kernel(%arg0: i32, %arg1: i32, %arg2: memref<1x2x512xf32, #tpu.memory_space<vmem>>, %arg3: memref<2x1xf32, #tpu.memory_space<vmem>>, %arg4: memref<2x1xf32, #tpu.memory_space<vmem>>, %arg5: memref<1x2x512xf32, #tpu.memory_space<vmem>>) attributes {dimension_semantics = [#tpu.dimension_semantics<parallel>, #tpu.dimension_semantics<parallel>], iteration_bounds = array<i64: 4, 1>, scalar_prefetch = 0 : i64, scratch_operands = 0 : i64, tpu.core_type = #tpu.core_type<tc>, window_params = [{transform_indices = @transform_0, window_bounds = array<i64: 1, 2, 512>}, {pipeline_mode = #tpu.pipeline_mode<synchronous>, transform_indices = @transform_1, window_bounds = array<i64: 2, 1>}, {pipeline_mode = #tpu.pipeline_mode<synchronous>, transform_indices = @transform_2, window_bounds = array<i64: 2, 1>}, {transform_indices = @transform_3, window_bounds = array<i64: 1, 2, 512>}]} {
    %c0 = arith.constant 0 : index
    %c0_0 = arith.constant 0 : index
    %c0_1 = arith.constant 0 : index
    %0 = vector.load %arg2[%c0, %c0_0, %c0_1] : memref<1x2x512xf32, #tpu.memory_space<vmem>>, vector<1x2x512xf32>
    %c0_2 = arith.constant 0 : index
    %c0_3 = arith.constant 0 : index
    %1 = vector.load %arg3[%c0_2, %c0_3] : memref<2x1xf32, #tpu.memory_space<vmem>>, vector<2x1xf32>
    %2 = vector.shape_cast %1 : vector<2x1xf32> to vector<1x2x1xf32>
    %3 = vector.broadcast %2 : vector<1x2x1xf32> to vector<1x2x512xf32>
    %4 = arith.mulf %0, %3 : vector<1x2x512xf32>
    %c0_4 = arith.constant 0 : index
    %c0_5 = arith.constant 0 : index
    %5 = vector.load %arg4[%c0_4, %c0_5] : memref<2x1xf32, #tpu.memory_space<vmem>>, vector<2x1xf32>
    %6 = vector.shape_cast %5 : vector<2x1xf32> to vector<1x2x1xf32>
    %7 = vector.broadcast %6 : vector<1x2x1xf32> to vector<1x2x512xf32>
    %8 = arith.addf %4, %7 : vector<1x2x512xf32>
    %cst = arith.constant 0.000000e+00 : f32
    %9 = vector.broadcast %cst : f32 to vector<1x2x512xf32>
    %10 = arith.maximumf %8, %9 : vector<1x2x512xf32>
    %c0_6 = arith.constant 0 : index
    %c0_7 = arith.constant 0 : index
    %c0_8 = arith.constant 0 : index
    %11 = vector.load %arg5[%c0_6, %c0_7, %c0_8] : memref<1x2x512xf32, #tpu.memory_space<vmem>>, vector<1x2x512xf32>
    tpu.vector_store %arg5[%c0_6, %c0_7, %c0_8], %10 {strides = array<i32>} : memref<1x2x512xf32, #tpu.memory_space<vmem>>, vector<1x2x512xf32>,
    return
  }
  func.func @transform_0(%arg0: i32, %arg1: i32) -> (i32, i32, i32) {
    %c0_i32 = arith.constant 0 : i32
    %c0_i32_0 = arith.constant 0 : i32
    return %arg0, %c0_i32, %arg1 : i32, i32, i32
  }
  func.func @transform_1(%arg0: i32, %arg1: i32) -> (i32, i32) {
    %c0_i32 = arith.constant 0 : i32
    %c0_i32_0 = arith.constant 0 : i32
    %c0_i32_1 = arith.constant 0 : i32
    return %c0_i32, %c0_i32_0 : i32, i32
  }
  func.func @transform_2(%arg0: i32, %arg1: i32) -> (i32, i32) {
    %c0_i32 = arith.constant 0 : i32
    %c0_i32_0 = arith.constant 0 : i32
    %c0_i32_1 = arith.constant 0 : i32
    return %c0_i32, %c0_i32_0 : i32, i32
  }
  func.func @transform_3(%arg0: i32, %arg1: i32) -> (i32, i32, i32) {
    %c0_i32 = arith.constant 0 : i32
    %c0_i32_0 = arith.constant 0 : i32
    return %arg0, %c0_i32, %arg1 : i32, i32, i32
  }
}

</mosaic_0001>

<bundles_post_ra>
// kernel: upsample_forward.3
= control target key start
LH: loop header
LB: loop body
LE: loop exit
PB: predicated region body
PF: predicated region fallthrough
CT: control target
= control target key end

     0   :  { %s414_s12 = smov 0   ;;  %s416_s13 = smov 0   ;;  %s453_s0 = inlined_call_operand.vmem [shape: f32[4,2,512], index: 0, kind: input, shape index: {}]   ;;  %s454_s1 = inlined_call_operand.vmem [shape: f32[2,1], index: 1, kind: input, shape index: {}]   ;;  %s455_s2 = inlined_call_operand.vmem [shape: f32[2,1], index: 2, kind: input, shape index: {}]   ;;  %s456_s3 = inlined_call_operand.vmem [shape: f32[4,2,512], index: 3, kind: output, shape index: {}]  }
   0x1   :  { %s418_s14 = smov 0  }
   0x2 LB: > { %s25_s15 = sadd.s32 1, %s386_s13  ;;  %p332_p0 = scmp.ge.s32.totalorder %s390_s14, 1  ;;  %s390_s14 = sphi %s418_s14, %s13_s14   ;;  %s386_s13 = sphi %s416_s13, %s458_s13   ;;  %s382_s12 = sphi %s414_s12, %s457_s12  }
   0x3   : > { %p27_p1 = scmp.ge.s32.totalorder %s25_s15, 4  ;;  %p158_p2 = scmp.lt.s32.totalorder %s390_s14, 5 }
   0x5   : > { %s460_s15 = smov (%p27_p1, %s25_s15), 0  ;;  %p159_p3 = pnand %p332_p0, %p158_p2 }
   0x6   : > { %p191_p4 = scmp.lt.s32.totalorder (!%p159_p3), %s382_s12, 3 }
   0x7   : > { %162 = sbr.rel (%p159_p3) target bundleno = 149 (0x95), region = 32 }
   0xc   : > { %v211_v0 = vld [vmem:[%s454_s1] sm:$0x3]  ;;  %v392_v1 = vmov 0   ;;  %v393_v3 = vmov 269488144   ;;  %v219_v5 = vlaneseq  ;;  %s462_s12 = smov (!%p191_p4, %s382_s12), 3 }
   0xd   : > { %367 = vset.pattern.permute.xlu0 %v392_v1  ;;  %v225_v2 = vld [vmem:[%s455_s2] sm:$0x3]  ;;  %v217_v4 = vunpack.c.l.s4 %v393_v3  ;;  %s339_s20 = sshll.u32 %s462_s12, 3 }
   0xe   : > { %214 = vperm.xlu0 %367, %v211_v0   ;;  %v220_v7 = vshrl.u32 %v219_v5, 7  ;;  %s198_s23 = scalar_lea.vmem %s453_s0, %s339_s20  ;;  %s208_s26 = scalar_lea.vmem %s456_s3, %s339_s20 }
   0xf   : > { %v218_v6 = vunpack.c.0.s8 %v217_v4  ;;  %v210_v11 = vld [vmem:[%s198_s23] sm:$0xff] }
  0x11   : > { %v221_v8 = vsub.s32 %v218_v6, %v220_v7 }
  0x12   : > { %228 = vperm.xlu0 %367, %v225_v2  }
  0x89   : > { %v215_v9 = vpop.permute.xlu0 %214 }
  0x8a   : > { %v222_v10 = vrot.slane %v215_v9, %v221_v8 }
  0x8c   : > { %v224_v13 = vmul.f32 %v222_v10, %v210_v11 }
  0x8d   : > { %v229_v12 = vpop.permute.xlu0 %228 }
  0x8e   : > { %v236_v14 = vrot.slane %v229_v12, %v221_v8 }
  0x90   : > { %v238_v15 = vadd.f32 %v236_v14, %v224_v13 }
  0x92   : > { %v239_v16 = vmax.f32 %v238_v15, 0.0 }
  0x94   : > { %240 = vst [vmem:[%s208_s26] sm:$0xff] %v239_v16 }
  0x95 PF: > { %s13_s14 = sadd.s32 1, %s390_s14   ;;  %s457_s12 = smov %s386_s13 }
  0x96   : > { %p10_p5 = scmp.ge.s32.totalorder %s13_s14, 6   ;;  %s458_s13 = smov %s460_s15 }
  0x98   :  { %12 = sbr.rel (!%p10_p5) target bundleno = 2 (0x2), region = 62 }

// kernel: upsample_forward.2
= control target key start
LH: loop header
LB: loop body
LE: loop exit
PB: predicated region body
PF: predicated region fallthrough
CT: control target
= control target key end

     0   :  { %s715_s18 = smov 0   ;;  %s717_s19 = smov 0   ;;  %s783_s0 = inlined_call_operand.vmem [shape: f32[4,16,512], index: 0, kind: input, shape index: {}]   ;;  %s784_s1 = inlined_call_operand.vmem [shape: f32[4,2,16], index: 1, kind: input, shape index: {}]   ;;  %s785_s2 = inlined_call_operand.vmem [shape: f32[2,1], index: 2, kind: input, shape index: {}]   ;;  %s786_s3 = inlined_call_operand.vmem [shape: f32[4,2,512], index: 3, kind: output, shape index: {0}]   ;;  %s787_s4 = inlined_call_operand.vmem [shape: f32[2,1], index: 4, kind: output, shape index: {1}]   ;;  %s788_s5 = inlined_call_operand.vmem [shape: f32[2,1], index: 5, kind: output, shape index: {2}]  }
   0x1   :  { %s719_s20 = smov 0  }
   0x2 LB: > { %s28_s21 = sadd.s32 1, %s675_s19  ;;  %p614_p0 = scmp.ge.s32.totalorder %s679_s20, 1  ;;  %s679_s20 = sphi %s719_s20, %s16_s20   ;;  %s675_s19 = sphi %s717_s19, %s790_s19   ;;  %s671_s18 = sphi %s715_s18, %s789_s18  }
   0x3   : > { %p30_p1 = scmp.ge.s32.totalorder %s28_s21, 4  ;;  %p212_p2 = scmp.lt.s32.totalorder %s679_s20, 5 }
   0x5   : > { %s792_s21 = smov (%p30_p1, %s28_s21), 0  ;;  %p213_p3 = pnand %p614_p0, %p212_p2 }
   0x6   : > { %p253_p4 = scmp.lt.s32.totalorder (!%p213_p3), %s671_s18, 3  ;;  %p276_p5 = scmp.eq.s32.totalorder (!%p213_p3), %s671_s18, 0 }
   0x7   : > { %216 = sbr.rel (%p213_p3) target bundleno = 370 (0x172), region = 32 }
   0xc   : > { %s794_s18 = smov (!%p253_p4, %s671_s18), 3  ;;  %281 = sbr.rel (!%p276_p5) target bundleno = 17 (0x11), region = 36  ;;  %vm282_vm0 = vcmask (%p276_p5), 1024   ;;  %v681_v0 = vmov (%p276_p5), 0.0  }
   0xd   : > { %s625_s22 = sshll.u32 %s794_s18, 6  ;;  %s617_s23 = sshll.u32 %s794_s18, 1  ;;  %283 = vst.msk [vmem:[%s787_s4] sm:$0x3] (%p276_p5), %vm282_vm0, %v681_v0  ;;  %284 = vst.msk [vmem:[%s788_s5] sm:$0x3] (%p276_p5), %vm282_vm0, %v681_v0 }
   0xe   : > { %s260_s26 = scalar_lea.vmem %s783_s0, %s625_s22  ;;  %s265_s29 = scalar_lea.vmem %s784_s1, %s617_s23 }
   0xf   : > { %s626_s30 = sshll.u32 %s794_s18, 3 }
  0x10   : > { %s742_s8 = scalar_lea.vmem %s786_s3, %s626_s30 }
  0x11 PF: > { %v291_v1 = vld [vmem:[%s260_s26 + $0x28] sm:$0xff]  ;;  %v293_v2 = vld [vmem:[%s260_s26 + $0x38] sm:$0xff]  ;;  %v290_v3 = vld [vmem:[%s260_s26 + $0x20] sm:$0xff]  ;;  %vm300_vm1 = vcmask 130048   ;;  %v682_v10 = vmov 0.0   ;;  %v683_v12 = vmov 0   ;;  %v455_v15 = vlaneseq }
  0x12   : > { %332 = vmatprep.subr.mxu0 %v291_v1  ;;  %403 = vmatprep.subr.mxu1 %v293_v2  ;;  %v292_v4 = vld [vmem:[%s260_s26 + $0x30] sm:$0xff]  ;;  %v287_v5 = vld [vmem:[%s260_s26 + $0x8] sm:$0xff]  ;;  %v289_v6 = vld [vmem:[%s260_s26 + $0x18] sm:$0xff]  ;;  %v684_v13 = vmov 1983009808   ;;  %vm470_vm2 = vcmask 1041408  }
  0x13   : > { %333 = vmatpush1.msra.mxu0 %v290_v3  ;;  %404 = vmatpush1.msra.mxu1 %v292_v4  ;;  %v286_v7 = vld [vmem:[%s260_s26] sm:$0xff]  ;;  %v288_v8 = vld [vmem:[%s260_s26 + $0x10] sm:$0xff]  ;;  %v453_v14 = vunpack.c.l.s4 %v684_v13  ;;  %v456_v18 = vshrl.u32 %v455_v15, 7  ;;  %vm481_vm3 = vcmask 1024  }
  0x14   : > { %334 = vmatprep.subr.mxu0 %v287_v5  ;;  %405 = vmatprep.subr.mxu1 %v289_v6  ;;  %v285_v9 = vld [vmem:[%s265_s29] sm:$0x3] }
  0x15   : > { %335 = vmatpush1.msra.mxu0 %v286_v7  ;;  %368 = vmatprep.mubr.f32.mxu0 %v682_v10  ;;  %v294_v11 = vld [vmem:[%s785_s2] sm:$0x3]  ;;  %v454_v17 = vunpack.c.0.s8 %v453_v14 }
  0x16   : > { %406 = vmatpush1.msra.mxu1 %v288_v8  ;;  %439 = vmatprep.mubr.f32.mxu1 %v682_v10  ;;  %v469_v51 = vld [vmem:[%s787_s4] sm:$0x3] }
  0x17   : > { %621 = vmatmul.mubr.msk.f32.vlgmr.msra.gmra.mxu0 %vm300_vm1, %v285_v9  ;;  %622 = vmatmul.mubr.msk.f32.vlgmr.msra.gmra.mxu1 %vm300_vm1, %v285_v9  ;;  %v457_v27 = vsub.s32 %v454_v17, %v456_v18  ;;  %v483_v53 = vld [vmem:[%s788_s5] sm:$0x3] }
  0x18   : > { %656 = vset.pattern.permute.xlu0 %v683_v12 }
  0x19   : > { %297 = vperm.xlu0 %656, %v294_v11  }
  0x94   : > { %v298_v16 = vpop.permute.xlu0 %297 }
  0xd7   : > { %v370_v19 = vpop.f32.mrf.mxu0  ;;  %v441_v20 = vpop.f32.mrf.mxu1 }
  0xd8   : > { %v371_v21 = vadd.f32 %v370_v19, %v298_v16  ;;  %v442_v22 = vadd.f32 %v441_v20, %v298_v16 }
  0xd9   : > { %v372_v23 = vpop.f32.mrf.mxu0  ;;  %v443_v24 = vpop.f32.mrf.mxu1 }
  0xda   : > { %v484_v25 = vmul.f32 %v371_v21, %v371_v21  ;;  %v373_v26 = vadd.f32 %v372_v23, %v298_v16  ;;  %v444_v28 = vadd.f32 %v443_v24, %v298_v16  ;;  %v471_v29 = vsel %vm470_vm2, %v371_v21, 0.0 }
  0xdb   : > { %v486_v30 = vmul.f32 %v442_v22, %v442_v22  ;;  %v474_v36 = vsel %vm470_vm2, %v442_v22, 0.0 }
  0xdc   : > { %v450_v31 = vcombine.low %v371_v21, %v373_v26  ;;  %v472_v32 = vsel %vm470_vm2, %v373_v26, 0.0  ;;  %v485_v33 = vmul.f32 %v373_v26, %v373_v26  ;;  %v451_v34 = vcombine.low %v442_v22, %v444_v28 }
  0xdd   : > { %v473_v35 = vadd.f32 %v472_v32, %v471_v29  ;;  %v487_v37 = vmul.f32 %v444_v28, %v444_v28  ;;  %v488_v40 = vsel %vm470_vm2, %v484_v25, 0.0  ;;  %v476_v45 = vsel %vm470_vm2, %v444_v28, 0.0 }
  0xde   : > { %v458_v38 = vrot.slane %v450_v31, %v457_v27  ;;  %v465_v39 = vrot.slane %v451_v34, %v457_v27  ;;  %v489_v41 = vsel %vm470_vm2, %v485_v33, 0.0  ;;  %v491_v46 = vsel %vm470_vm2, %v486_v30, 0.0 }
  0xdf   : > { %v475_v42 = vadd.f32 %v474_v36, %v473_v35  ;;  %v490_v43 = vadd.f32 %v489_v41, %v488_v40  ;;  %v493_v49 = vsel %vm470_vm2, %v487_v37, 0.0 }
  0xe0   : > { %v466_v44 = vcombine.low %v458_v38, %v465_v39 }
  0xe1   : > { %v477_v47 = vadd.f32 %v476_v45, %v475_v42  ;;  %v492_v48 = vadd.f32 %v491_v46, %v490_v43 }
  0xe2   : > { %468 = vst [vmem:[%s742_s8] sm:$0xff] %v466_v44 }
  0xe3   : > { %478 = vadd.xlane.f32.xlu0 %v477_v47  ;;  %v494_v50 = vadd.f32 %v493_v49, %v492_v48 }
  0xe5   : > { %495 = vadd.xlane.f32.xlu1 %v494_v50 }
 0x16c   : > { %v479_v52 = vpop.xlane.xlu0 %478 }
 0x16d   : > { %v480_v54 = vadd.f32 %v479_v52, %v469_v51 }
 0x16e   : > { %v496_v55 = vpop.xlane.xlu1 %495 }
 0x16f   : > { %482 = vst.msk [vmem:[%s787_s4] sm:$0x3] %vm481_vm3, %v480_v54  ;;  %v497_v56 = vadd.f32 %v496_v55, %v483_v53 }
 0x171   : > { %498 = vst.msk [vmem:[%s788_s5] sm:$0x3] %vm481_vm3, %v497_v56 }
 0x172 PF: > { %s16_s20 = sadd.s32 1, %s679_s20   ;;  %s789_s18 = smov %s675_s19 }
 0x173   : > { %p13_p6 = scmp.ge.s32.totalorder %s16_s20, 6   ;;  %s790_s19 = smov %s792_s21 }
 0x175   :  { %15 = sbr.rel (!%p13_p6) target bundleno = 2 (0x2), region = 85 }

</bundles_post_ra>
